<compile_context>
chip_gen: v6e
topology: v6e:2x2x1
jax: 0.10.0
libtpu: 0.0.40
codegen_flags: <defaults>
</compile_context>

<pallas_src>
import jax
import jax.numpy as jnp
import numpy as np
from jax.experimental import pallas as pl
from jax.experimental.pallas import tpu as pltpu

_INV_SQRT2 = 0.7071067811865476


def _erf(z):
    # Abramowitz & Stegun 7.1.26 polynomial approximation (|err| < 1.5e-7).
    a = jnp.abs(z)
    t = 1.0 / (1.0 + 0.3275911 * a)
    poly = t * (0.254829592 + t * (-0.284496736 +
              t * (1.421413741 + t * (-1.453152027 + t * 1.061405429))))
    e = 1.0 - poly * jnp.exp(-a * a)
    return jnp.where(z >= 0.0, e, -e)


def _gelu_exact(x):
    return 0.5 * x * (1.0 + _erf(x * _INV_SQRT2))


def basic_block_kernel(x_ref, w1t_ref, w2t_ref, k_ref, out_ref):
    """x_ref: (B, C, HW) native dtype; w1t_ref: (C, Cr) f32; w2t_ref: (Cr, C) f32;
    k_ref: (2*HW, HW) f32 masked-shift conv matrix; out_ref: (B, 2C, HW) native dtype."""
    x = x_ref[...].astype(jnp.float32)                         # (B, C, HW)
    B, C, HW = x.shape

    # ---------------- Channel attention ----------------
    avg_c = jnp.sum(x, axis=2) * (1.0 / HW)                    # (B, C)  adaptive avg pool
    max_c = jnp.max(x, axis=2)                                 # (B, C)  adaptive max pool
    pooled = jnp.concatenate([avg_c, max_c], axis=0)           # (2B, C) rows: avg..., max...

    # fc1 -> GELU -> fc2 for both pooled vectors of all samples at once (two tiny
    # MXU matmuls against pre-transposed weights).
    h = jnp.dot(pooled, w1t_ref[...], preferred_element_type=jnp.float32)   # (2B, Cr)
    h = _gelu_exact(h)
    o = jnp.dot(h, w2t_ref[...], preferred_element_type=jnp.float32)        # (2B, C)
    att_c = jnp.maximum(o[:B] + o[B:], 0.0)[:, :, None]        # ReLU(avg+max), (B, C, 1)

    # ---------------- Spatial attention ----------------
    avg_s = jnp.sum(x, axis=1) * (1.0 / C)                     # (B, HW) mean over channels
    max_s = jnp.max(x, axis=1)                                 # (B, HW) max  over channels
    pooled_s = jnp.concatenate([avg_s, max_s], axis=1)         # (B, 2*HW)

    # 7x7 zero-padded conv (2 -> 1, no bias) as a single matmul against the
    # host-precomputed (weight x zero-padding-validity) shift matrix.
    conv = jnp.dot(pooled_s, k_ref[...], preferred_element_type=jnp.float32)  # (B, HW)
    att_s = jax.nn.sigmoid(jnp.maximum(conv, 0.0))             # sigmoid(relu(conv))

    # ---------------- concat([ca(x), sa(x)], dim=channel) ----------------
    out_ref[:, 0:C, :] = (x * (att_c + 1.0)).astype(out_ref.dtype)           # x*att + x
    out_ref[:, C:2 * C, :] = (x * (att_s[:, None, :] + 1.0)).astype(out_ref.dtype)


def _conv_matrix(wsp, H, W):
    """Masked shift matrix K (2*HW, HW) for the zero-padded 7x7 cross-correlation.
    conv[b, p] = sum_q avg_s[b, q] * K[q, p] + max_s[b, q] * K[HW + q, p],
    where K[c*HW + q, p] = wsp[0, c, i, j] iff source pixel q = output pixel p shifted
    by (i-3, j-3) and lies inside the HxW image (zero padding)."""
    HW = H * W
    w = np.asarray(wsp, dtype=np.float32).reshape(2, 7, 7)
    K = np.zeros((2 * HW, HW), np.float32)
    p_idx_all = np.arange(HW)
    ph, pw = np.divmod(p_idx_all, W)
    for i in range(7):
        for j in range(7):
            qh, qw = ph + i - 3, pw + j - 3
            valid = (qh >= 0) & (qh < H) & (qw >= 0) & (qw < W)
            q_idx = (qh * W + qw)[valid]
            p_idx = p_idx_all[valid]
            K[q_idx, p_idx] = w[0, i, j]
            K[HW + q_idx, p_idx] = w[1, i, j]
    return jnp.asarray(K)


def _split_batches(N, target):
    """Pick a block size <= target that divides a 'main' prefix of the batch and gives
    >= 2 grid steps whenever N >= 2 (so v7x's second TensorCore is used).  The remainder
    (if any) is handled by a second tiny pallas_call — no padding, no dead HBM traffic."""
    if N >= 2 * target:
        bt = target
    elif N >= 2:
        bt = max(1, N // 2)
    else:
        bt = 1
    main = (N // bt) * bt
    return bt, main, N - main


def basic_block(x_nchw, w1, w2, wsp, *, target_block_b=32):
    """x_nchw: (N, C, H, W); w1: (C//ratio, C) fc1 weight; w2: (C, C//ratio) fc2 weight;
    wsp: (1, 2, 7, 7) spatial conv weight.  Returns (N, 2C, H, W) in x's dtype."""
    N, C, H, W = x_nchw.shape
    Cr = w1.shape[0]
    HW = H * W

    k_mat = _conv_matrix(wsp, H, W)                      # (2*HW, HW) f32, built on host
    w1t = jnp.asarray(w1, jnp.float32).T                 # (C, Cr)
    w2t = jnp.asarray(w2, jnp.float32).T                 # (Cr, C)

    # Free reshape: NCHW is contiguous in (H, W).  Keep the native dtype end-to-end.
    x_flat = x_nchw.reshape(N, C, HW)

    def _call(x_part, block_b):
        n = x_part.shape[0]
        return pl.pallas_call(
            basic_block_kernel,
            out_shape=jax.ShapeDtypeStruct((n, 2 * C, HW), x_part.dtype),
            grid=(n // block_b,),
            in_specs=[
                pl.BlockSpec((block_b, C, HW), lambda i: (i, 0, 0)),
                pl.BlockSpec((C, Cr), lambda i: (0, 0)),
                pl.BlockSpec((Cr, C), lambda i: (0, 0)),
                pl.BlockSpec((2 * HW, HW), lambda i: (0, 0)),
            ],
            out_specs=pl.BlockSpec((block_b, 2 * C, HW), lambda i: (i, 0, 0)),
            compiler_params=pltpu.CompilerParams(
                dimension_semantics=("parallel",),   # independent batch axis -> megacore
            ),
        )(x_part, w1t, w2t, k_mat)

    bt, main, rem = _split_batches(N, target_block_b)
    parts = []
    if main:
        parts.append(_call(x_flat[:main], bt))
    if rem:
        parts.append(_call(x_flat[main:], rem))
    out = parts[0] if len(parts) == 1 else jnp.concatenate(parts, axis=0)

    # Free reshape back to NCHW.
    return out.reshape(N, 2 * C, H, W)


def reference_nchw(x, w1, w2, wsp):
    """Pure-JAX reference matching the PyTorch forward semantics (NCHW)."""
    avg = jnp.mean(x, axis=(2, 3), keepdims=True)
    mx = jnp.max(x, axis=(2, 3), keepdims=True)

    def mlp(v):
        h = jnp.einsum('rc,ncij->nrij', w1, v)
        h = 0.5 * h * (1.0 + jax.scipy.special.erf(h * _INV_SQRT2))  # exact GELU
        return jnp.einsum('cr,nrij->ncij', w2, h)

    att = jax.nn.relu(mlp(avg) + mlp(mx))
    y_ca = x * att + x

    avg_s = jnp.mean(x, axis=1, keepdims=True)
    max_s = jnp.max(x, axis=1, keepdims=True)
    s = jnp.concatenate([avg_s, max_s], axis=1)
    conv = jax.lax.conv_general_dilated(
        s, wsp, window_strides=(1, 1), padding=((3, 3), (3, 3)),
        dimension_numbers=('NCHW', 'OIHW', 'NCHW'))
    att_s = jax.nn.sigmoid(jax.nn.relu(conv))
    y_sa = x * att_s + x

    return jnp.concatenate([y_ca, y_sa], axis=1)


if __name__ == "__main__":
    key = jax.random.PRNGKey(0)
    k1, k2, k3, k4 = jax.random.split(key, 4)

    N, C, H, W = 2, 32, 16, 16        # planes=32 so that planes // ratio(=16) >= 1
    ratio = 16
    Cr = C // ratio

    x = jax.random.normal(k1, (N, C, H, W), dtype=jnp.float32)
    w1 = jax.random.normal(k2, (Cr, C), dtype=jnp.float32) * 0.2        # fc1 1x1 conv weight
    w2 = jax.random.normal(k3, (C, Cr), dtype=jnp.float32) * 0.2        # fc2 1x1 conv weight
    wsp = jax.random.normal(k4, (1, 2, 7, 7), dtype=jnp.float32) * 0.1  # spatial 7x7 conv weight

    out = jax.block_until_ready(basic_block(x, w1, w2, wsp))
    ref = jax.block_until_ready(reference_nchw(x, w1, w2, wsp))

    assert out.shape == (N, 2 * C, H, W), out.shape
    err = float(jnp.max(jnp.abs(out - ref)))
    assert jnp.allclose(out, ref, rtol=1e-4, atol=1e-4), err
    print("KERNEL_OK")
</pallas_src>

<mosaic_0001>
module attributes {stable_mosaic.version = 11 : i64} {
  func.func @basic_block_kernel(%arg0: i32, %arg1: memref<1x32x256xf32, #tpu.memory_space<vmem>>, %arg2: memref<32x2xf32, #tpu.memory_space<vmem>>, %arg3: memref<2x32xf32, #tpu.memory_space<vmem>>, %arg4: memref<512x256xf32, #tpu.memory_space<vmem>>, %arg5: memref<1x64x256xf32, #tpu.memory_space<vmem>>) attributes {dimension_semantics = [#tpu.dimension_semantics<parallel>], iteration_bounds = array<i64: 2>, scalar_prefetch = 0 : i64, scratch_operands = 0 : i64, tpu.core_type = #tpu.core_type<tc>, window_params = [{transform_indices = @transform_0, window_bounds = array<i64: 1, 32, 256>}, {pipeline_mode = #tpu.pipeline_mode<synchronous>, transform_indices = @transform_1, window_bounds = array<i64: 32, 2>}, {pipeline_mode = #tpu.pipeline_mode<synchronous>, transform_indices = @transform_2, window_bounds = array<i64: 2, 32>}, {pipeline_mode = #tpu.pipeline_mode<synchronous>, transform_indices = @transform_3, window_bounds = array<i64: 512, 256>}, {transform_indices = @transform_4, window_bounds = array<i64: 1, 64, 256>}]} {
    %c0 = arith.constant 0 : index
    %c0_0 = arith.constant 0 : index
    %c0_1 = arith.constant 0 : index
    %0 = vector.load %arg1[%c0, %c0_0, %c0_1] : memref<1x32x256xf32, #tpu.memory_space<vmem>>, vector<1x32x256xf32>
    %cst = arith.constant dense<0.000000e+00> : vector<1x32xf32>
    %1 = vector.multi_reduction <add>, %0, %cst [2] : vector<1x32x256xf32> to vector<1x32xf32>
    %cst_2 = arith.constant 3.906250e-03 : f32
    %2 = vector.broadcast %cst_2 : f32 to vector<1x32xf32>
    %3 = arith.mulf %1, %2 : vector<1x32xf32>
    %cst_3 = arith.constant dense<0xFF800000> : vector<1x32xf32>
    %4 = vector.multi_reduction <maximumf>, %0, %cst_3 [2] : vector<1x32x256xf32> to vector<1x32xf32>
    %5 = tpu.concatenate %3, %4 in 0 : vector<1x32xf32>, vector<1x32xf32> -> vector<2x32xf32>
    %c0_4 = arith.constant 0 : index
    %c0_5 = arith.constant 0 : index
    %6 = vector.load %arg2[%c0_4, %c0_5] : memref<32x2xf32, #tpu.memory_space<vmem>>, vector<32x2xf32>
    %cst_6 = arith.constant dense<0.000000e+00> : vector<2x2xf32>
    %7 = tpu.matmul %5, %6, %cst_6 {dimension_numbers = #tpu.dot_dimension_numbers<[1], [0], [0], [1], [0, 0, 1, 1], [], []>} : vector<2x32xf32>, vector<32x2xf32>, vector<2x2xf32> -> vector<2x2xf32>
    %cst_7 = arith.constant 5.000000e-01 : f32
    %8 = vector.broadcast %cst_7 : f32 to vector<2x2xf32>
    %9 = arith.mulf %8, %7 : vector<2x2xf32>
    %cst_8 = arith.constant 0.707106769 : f32
    %10 = vector.broadcast %cst_8 : f32 to vector<2x2xf32>
    %11 = arith.mulf %7, %10 : vector<2x2xf32>
    %12 = math.absf %11 : vector<2x2xf32>
    %cst_9 = arith.constant 0.327591091 : f32
    %13 = vector.broadcast %cst_9 : f32 to vector<2x2xf32>
    %14 = arith.mulf %13, %12 : vector<2x2xf32>
    %cst_10 = arith.constant 1.000000e+00 : f32
    %15 = vector.broadcast %cst_10 : f32 to vector<2x2xf32>
    %16 = arith.addf %15, %14 : vector<2x2xf32>
    %cst_11 = arith.constant 1.000000e+00 : f32
    %17 = vector.broadcast %cst_11 : f32 to vector<2x2xf32>
    %18 = arith.divf %17, %16 : vector<2x2xf32>
    %cst_12 = arith.constant 1.06140542 : f32
    %19 = vector.broadcast %cst_12 : f32 to vector<2x2xf32>
    %20 = arith.mulf %18, %19 : vector<2x2xf32>
    %cst_13 = arith.constant -1.45315206 : f32
    %21 = vector.broadcast %cst_13 : f32 to vector<2x2xf32>
    %22 = arith.addf %21, %20 : vector<2x2xf32>
    %23 = arith.mulf %18, %22 : vector<2x2xf32>
    %cst_14 = arith.constant 1.42141378 : f32
    %24 = vector.broadcast %cst_14 : f32 to vector<2x2xf32>
    %25 = arith.addf %24, %23 : vector<2x2xf32>
    %26 = arith.mulf %18, %25 : vector<2x2xf32>
    %cst_15 = arith.constant -0.284496725 : f32
    %27 = vector.broadcast %cst_15 : f32 to vector<2x2xf32>
    %28 = arith.addf %27, %26 : vector<2x2xf32>
    %29 = arith.mulf %18, %28 : vector<2x2xf32>
    %cst_16 = arith.constant 0.254829586 : f32
    %30 = vector.broadcast %cst_16 : f32 to vector<2x2xf32>
    %31 = arith.addf %30, %29 : vector<2x2xf32>
    %32 = arith.mulf %18, %31 : vector<2x2xf32>
    %cst_17 = arith.constant 0.000000e+00 : f32
    %33 = vector.broadcast %cst_17 : f32 to vector<2x2xf32>
    %34 = arith.subf %33, %12 : vector<2x2xf32>
    %35 = arith.mulf %34, %12 : vector<2x2xf32>
    %36 = math.exp %35 : vector<2x2xf32>
    %37 = arith.mulf %32, %36 : vector<2x2xf32>
    %cst_18 = arith.constant 1.000000e+00 : f32
    %38 = vector.broadcast %cst_18 : f32 to vector<2x2xf32>
    %39 = arith.subf %38, %37 : vector<2x2xf32>
    %cst_19 = arith.constant 0.000000e+00 : f32
    %40 = vector.broadcast %cst_19 : f32 to vector<2x2xf32>
    %41 = arith.cmpf oge, %11, %40 : vector<2x2xf32>
    %cst_20 = arith.constant 0.000000e+00 : f32
    %42 = vector.broadcast %cst_20 : f32 to vector<2x2xf32>
    %43 = arith.subf %42, %39 : vector<2x2xf32>
    %44 = arith.select %41, %39, %43 : vector<2x2xi1>, vector<2x2xf32>
    %cst_21 = arith.constant 1.000000e+00 : f32
    %45 = vector.broadcast %cst_21 : f32 to vector<2x2xf32>
    %46 = arith.addf %45, %44 : vector<2x2xf32>
    %47 = arith.mulf %9, %46 : vector<2x2xf32>
    %c0_22 = arith.constant 0 : index
    %c0_23 = arith.constant 0 : index
    %48 = vector.load %arg3[%c0_22, %c0_23] : memref<2x32xf32, #tpu.memory_space<vmem>>, vector<2x32xf32>
    %cst_24 = arith.constant dense<0.000000e+00> : vector<2x32xf32>
    %49 = tpu.matmul %47, %48, %cst_24 {dimension_numbers = #tpu.dot_dimension_numbers<[1], [0], [0], [1], [0, 0, 1, 1], [], []>} : vector<2x2xf32>, vector<2x32xf32>, vector<2x32xf32> -> vector<2x32xf32>
    %50 = vector.extract_strided_slice %49 {offsets = [0, 0], sizes = [1, 32], strides = [1, 1]} : vector<2x32xf32> to vector<1x32xf32>
    %51 = vector.extract_strided_slice %49 {offsets = [1, 0], sizes = [1, 32], strides = [1, 1]} : vector<2x32xf32> to vector<1x32xf32>
    %52 = arith.addf %50, %51 : vector<1x32xf32>
    %cst_25 = arith.constant 0.000000e+00 : f32
    %53 = vector.broadcast %cst_25 : f32 to vector<1x32xf32>
    %54 = arith.maximumf %52, %53 : vector<1x32xf32>
    %55 = vector.shape_cast %54 : vector<1x32xf32> to vector<1x32x1xf32>
    %cst_26 = arith.constant dense<0.000000e+00> : vector<1x256xf32>
    %56 = vector.multi_reduction <add>, %0, %cst_26 [1] : vector<1x32x256xf32> to vector<1x256xf32>
    %cst_27 = arith.constant 3.125000e-02 : f32
    %57 = vector.broadcast %cst_27 : f32 to vector<1x256xf32>
    %58 = arith.mulf %56, %57 : vector<1x256xf32>
    %cst_28 = arith.constant dense<0xFF800000> : vector<1x256xf32>
    %59 = vector.multi_reduction <maximumf>, %0, %cst_28 [1] : vector<1x32x256xf32> to vector<1x256xf32>
    %60 = tpu.concatenate %58, %59 in 1 : vector<1x256xf32>, vector<1x256xf32> -> vector<1x512xf32>
    %c0_29 = arith.constant 0 : index
    %c0_30 = arith.constant 0 : index
    %61 = vector.load %arg4[%c0_29, %c0_30] : memref<512x256xf32, #tpu.memory_space<vmem>>, vector<512x256xf32>
    %cst_31 = arith.constant dense<0.000000e+00> : vector<1x256xf32>
    %62 = tpu.matmul %60, %61, %cst_31 {dimension_numbers = #tpu.dot_dimension_numbers<[1], [0], [0], [1], [0, 0, 1, 1], [], []>} : vector<1x512xf32>, vector<512x256xf32>, vector<1x256xf32> -> vector<1x256xf32>
    %cst_32 = arith.constant 0.000000e+00 : f32
    %63 = vector.broadcast %cst_32 : f32 to vector<1x256xf32>
    %64 = arith.maximumf %62, %63 : vector<1x256xf32>
    %65 = arith.negf %64 : vector<1x256xf32>
    %66 = math.exp %65 : vector<1x256xf32>
    %cst_33 = arith.constant 1.000000e+00 : f32
    %67 = vector.broadcast %cst_33 : f32 to vector<1x256xf32>
    %68 = arith.addf %67, %66 : vector<1x256xf32>
    %69 = arith.divf %67, %68 : vector<1x256xf32>
    %cst_34 = arith.constant 1.000000e+00 : f32
    %70 = vector.broadcast %cst_34 : f32 to vector<1x32x1xf32>
    %71 = arith.addf %55, %70 : vector<1x32x1xf32>
    %72 = vector.broadcast %71 : vector<1x32x1xf32> to vector<1x32x256xf32>
    %73 = arith.mulf %0, %72 : vector<1x32x256xf32>
    %c0_35 = arith.constant 0 : index
    %c0_36 = arith.constant 0 : index
    %c0_37 = arith.constant 0 : index
    %74 = vector.load %arg5[%c0_35, %c0_36, %c0_37] : memref<1x64x256xf32, #tpu.memory_space<vmem>>, vector<1x32x256xf32>
    tpu.vector_store %arg5[%c0_35, %c0_36, %c0_37], %73 {strides = array<i32>} : memref<1x64x256xf32, #tpu.memory_space<vmem>>, vector<1x32x256xf32>,
    %75 = vector.shape_cast %69 : vector<1x256xf32> to vector<1x1x256xf32>
    %cst_38 = arith.constant 1.000000e+00 : f32
    %76 = vector.broadcast %cst_38 : f32 to vector<1x1x256xf32>
    %77 = arith.addf %75, %76 : vector<1x1x256xf32>
    %78 = vector.broadcast %77 : vector<1x1x256xf32> to vector<1x32x256xf32>
    %79 = arith.mulf %0, %78 : vector<1x32x256xf32>
    %c0_39 = arith.constant 0 : index
    %c32 = arith.constant 32 : index
    %c0_40 = arith.constant 0 : index
    %80 = vector.load %arg5[%c0_39, %c32, %c0_40] : memref<1x64x256xf32, #tpu.memory_space<vmem>>, vector<1x32x256xf32>
    tpu.vector_store %arg5[%c0_39, %c32, %c0_40], %79 {strides = array<i32>} : memref<1x64x256xf32, #tpu.memory_space<vmem>>, vector<1x32x256xf32>,
    return
  }
  func.func @transform_0(%arg0: i32) -> (i32, i32, i32) {
    %c0_i32 = arith.constant 0 : i32
    %c0_i32_0 = arith.constant 0 : i32
    %c0_i32_1 = arith.constant 0 : i32
    return %arg0, %c0_i32, %c0_i32_0 : i32, i32, i32
  }
  func.func @transform_1(%arg0: i32) -> (i32, i32) {
    %c0_i32 = arith.constant 0 : i32
    %c0_i32_0 = arith.constant 0 : i32
    %c0_i32_1 = arith.constant 0 : i32
    return %c0_i32, %c0_i32_0 : i32, i32
  }
  func.func @transform_2(%arg0: i32) -> (i32, i32) {
    %c0_i32 = arith.constant 0 : i32
    %c0_i32_0 = arith.constant 0 : i32
    %c0_i32_1 = arith.constant 0 : i32
    return %c0_i32, %c0_i32_0 : i32, i32
  }
  func.func @transform_3(%arg0: i32) -> (i32, i32) {
    %c0_i32 = arith.constant 0 : i32
    %c0_i32_0 = arith.constant 0 : i32
    %c0_i32_1 = arith.constant 0 : i32
    return %c0_i32, %c0_i32_0 : i32, i32
  }
  func.func @transform_4(%arg0: i32) -> (i32, i32, i32) {
    %c0_i32 = arith.constant 0 : i32
    %c0_i32_0 = arith.constant 0 : i32
    %c0_i32_1 = arith.constant 0 : i32
    return %arg0, %c0_i32, %c0_i32_0 : i32, i32, i32
  }
}

</mosaic_0001>

<bundles_post_ra>
// kernel: tpu_custom_call.1
= control target key start
LH: loop header
LB: loop body
LE: loop exit
PB: predicated region body
PF: predicated region fallthrough
CT: control target
= control target key end

     0   :  { %9 = vsyncpa [#allocation3], 0  ;;  %s1568_s0 = inlined_call_operand.hbm [shape: f32[2,32,256], index: 0, kind: input, shape index: {}]   ;;  %s1569_s1 = inlined_call_operand.vmem [shape: f32[32,2], index: 1, kind: input, shape index: {}]   ;;  %s1570_s2 = inlined_call_operand.vmem [shape: f32[2,32], index: 2, kind: input, shape index: {}]   ;;  %s1571_s3 = inlined_call_operand.hbm [shape: f32[512,256], index: 3, kind: input, shape index: {}]   ;;  %s1572_s4 = inlined_call_operand.hbm [shape: f32[2,64,256], index: 4, kind: output, shape index: {}]  }
   0x1   :  { %11 = vsyncpa [#allocation3 + $0x1], 0 }
   0x2   :  { %12 = vsyncpa [#allocation6], 0 }
   0x3   :  { %13 = vsyncpa [#allocation4], 0 }
   0x4   :  { %15 = vsyncpa [#allocation4 + $0x1], 0  ;;  %s1277_s15 = smov 0   ;;  %s1279_s16 = smov 0  }
   0x5   :  { %s1281_s17 = smov 0   ;;  %s1283_s18 = smov 0  }
   0x6 LB: > { %s1298_s19 = sadd.s32 4294967295, %s1241_s18   ;;  %s998_s20 = sadd.s32 4294967294, %s1241_s18   ;;  %s1241_s18 = sphi %s1283_s18, %s1594_s18   ;;  %s1237_s17 = sphi %s1281_s17, %s1593_s17   ;;  %s1233_s16 = sphi %s1279_s16, %s1592_s16   ;;  %s1229_s15 = sphi %s1277_s15, %s1591_s15  }
   0x7   : > { %p41_p0 = scmp.ne.s32.totalorder %s1233_s16, %s1229_s15  ;;  %p1573_p1 = scmp.eq.s32.totalorder %s1298_s19, 0 }
   0x8   : > { %p134_p3 = scmp.eq.s32.totalorder %s998_s20, 1  ;;  %p999_p5 = scmp.ge.s32.totalorder %s1241_s18, 1 }
   0x9   : > { %p1307_p4 = por %p1573_p1, %p41_p0  ;;  %p141_p7 = scmp.lt.s32.totalorder %s1241_s18, 3 }
   0xa   : > { %p1312_p6 = por %p134_p3, %p41_p0  ;;  %s1243_s24 = smov [#allocation5]  }
   0xb   : > { %s1577_s21 = scalar_select %p1307_p4, 1, 0 }
   0xc   : > { %s1578_s22 = scalar_select %p1312_p6, 1, 0 }
   0xd   : > { %p1317_p8 = pnand %p999_p5, %p141_p7  ;;  %s159_s25 = sshll.u32 %s1243_s24, 4  ;;  %s160_s25 = int_to_ptr.vmem [resolvable:$true] %s159_s25 }
   0xe   : > { %s1331_s27 = sadd.s32 1, %s1241_s18   ;;  %s28_s28 = sadd.s32 1, %s1237_s17 }
   0xf   : > { %s1579_s23 = scalar_select %p1317_p8, 1, 0 }
  0x10   : > { %p1052_p9 = pneg %p1317_p8  ;;  %s25_s29 = ssub.s32 %s1241_s18, %s1331_s27 }
  0x11   : > { %s1130_s30 = scalar_lea.vmem %s160_s25, 16384  ;;  %p1138_p5 = scmp.lt.s32.totalorder %s160_s25, %s160_s25 }
  0x12   : > { %p1326_p11 = pnand %p1052_p9, %p1573_p1  ;;  %p1131_p13 = scmp.ne.s32.totalorder %s160_s25, %s1130_s30 }
  0x13   : > { %p1139_p7 = scmp.lt.s32.totalorder %s1130_s30, %s1130_s30 }
  0x14   : > { %p1121_p12 = pneg %p1326_p11 }
  0x15   : > { %p1140_p10 = por %p1139_p7, %p1138_p5 }
  0x16   : > { %p1133_p0 = pnand %p1131_p13, %p1121_p12 }
  0x18   : > { %p1134_p3 = pneg %p1133_p0 }
  0x1a   : > { %p1141_p2 = pnand %p1140_p10, %p1134_p3 }
  0x1c   : > { %1144 = shalt.err (!%p1141_p2)
}
  0x1d   : > { %s1244_s5 = smov 256   ;;  %s1245_s6 = smov 16  }
  0x1e   : > { %1055 = dma.hbm_to_vmem [thread:$0]  (!%p1326_p11), %s1571_s3, 16384, %s160_s25, [#allocation6], %s1244_s5, %s1244_s5, %s1245_s6  }
  0x1f   : > { %p26_p2 = scmp.eq.s32.totalorder %s25_s29, 0  ;;  %p35_p9 = scmp.ne.s32.totalorder %s1237_s17, %s1233_s16 }
  0x20   : > { %p36_p10 = scmp.eq.s32.totalorder %s1241_s18, 0  ;;  %p1065_p12 = scmp.lt.s32.totalorder %s1241_s18, 2 }
  0x21   : > { %s1351_s9 = scalar_select %p26_p2, %s1237_s17, %s28_s28  }
  0x22   : > { %p37_p13 = por %p36_p10, %p35_p9  ;;  %p1581_p0 = scmp.eq.s32.totalorder %s1298_s19, 1 }
  0x23   : > { %s173_s11 = sand.u32 1, %s1237_s17   ;;  %s1019_s12 = sshll.u32 %s1241_s18, 10 }
  0x24   : > { %p1355_p3 = por %p1581_p0, %p35_p9  ;;  %s1002_s13 = sshll.u32 %s173_s11, 6 }
  0x25   : > { %s1364_s24 = scalar_lea.hbm %s1568_s0, %s1019_s12  ;;  %s177_s25 = scalar_lea.vmem [#allocation2], %s1002_s13 }
  0x26   : > { %s1582_s10 = scalar_select %p1355_p3, 1, 0 }
  0x27   : > { %s184_s26 = sshll.u32 %s177_s25, 4  ;;  %p1366_p11 = pnand %p1065_p12, %p37_p13  ;;  %s1370_s26 = int_to_ptr.vmem [resolvable:$true] %s184_s26 }
  0x28   : > { %s1372_s29 = scalar_lea.sflag [#allocation3], %s173_s11  ;;  %s1145_s30 = scalar_lea.hbm %s1364_s24, 1024 }
  0x29   : > { %p1146_p5 = scmp.ne.s32.totalorder %s1364_s24, %s1145_s30  ;;  %p1147_p7 = pneg %p1366_p11 }
  0x2a   : > { %s1150_s12 = scalar_lea.hbm %s1568_s0, 2048  ;;  %p1151_p10 = scmp.lt.s32.totalorder %s1364_s24, %s1568_s0 }
  0x2b   : > { %p1148_p2 = pnand %p1147_p7, %p1146_p5  ;;  %p1152_p12 = scmp.lt.s32.totalorder %s1150_s12, %s1145_s30 }
  0x2d   : > { %p1149_p9 = pneg %p1148_p2  ;;  %p1153_p13 = por %p1152_p12, %p1151_p10 }
  0x2f   : > { %p1154_p0 = pnand %p1153_p13, %p1149_p9 }
  0x31   : > { %1157 = shalt.err (!%p1154_p0)
}
  0x32   : > { %s1158_s11 = scalar_lea.vmem %s1370_s26, 1024  ;;  %s1246_s20 = smov [#allocation2]  }
  0x33   : > { %p1159_p1 = scmp.ne.s32.totalorder %s1370_s26, %s1158_s11  ;;  %s1163_s25 = sshll.u32 %s1246_s20, 4  ;;  %s1164_s25 = int_to_ptr.vmem [resolvable:$false] %s1163_s25 }
  0x34   : > { %s1165_s7 = scalar_lea.vmem %s1164_s25, 2048  ;;  %p1166_p2 = scmp.lt.s32.totalorder %s1370_s26, %s1164_s25 }
  0x35   : > { %p1161_p6 = pnand %p1159_p1, %p1147_p7  ;;  %p1167_p3 = scmp.lt.s32.totalorder %s1165_s7, %s1158_s11 }
  0x37   : > { %p1162_p5 = pneg %p1161_p6  ;;  %p1168_p4 = por %p1167_p3, %p1166_p2 }
  0x39   : > { %p1169_p8 = pnand %p1168_p4, %p1162_p5 }
  0x3b   : > { %1172 = shalt.err (!%p1169_p8)
}
  0x3c   : > { %1059 = dma.hbm_to_vmem [thread:$0]  (!%p1366_p11), %s1364_s24, 1024, %s1370_s26, %s1372_s29, %s1244_s5, %s1244_s5, %s1245_s6  }
  0x3d   : > { %p1584_p1 = scmp.ne.s32.totalorder %s1579_s23, 0 }
  0x3e   : > { %s1399_s30 = sand.u32 (!%p1584_p1), 1, %s1233_s16   ;;  %p1585_p4 = scmp.ne.s32.totalorder (!%p1584_p1), %s1577_s21, 0 }
  0x3f   : > { %196 = sbr.rel (%p1584_p1) target bundleno = 817 (0x331), region = 36  ;;  %s1006_s8 = sshll.u32 (!%p1584_p1), %s1399_s30, 6 }
  0x40   : > { %s199_s12 = scalar_lea.sflag (!%p1584_p1), [#allocation3], %s1399_s30  ;;  %s202_s13 = scalar_lea.vmem (!%p1584_p1), [#allocation2], %s1006_s8 }
  0x44   : > { %1216 = dma.done.wait (%p1585_p4), %s199_s12, 1024  }
  0x45   : > { %1218 = vsyncadd (%p1585_p4), %s199_s12, 4294966272  ;;  %p1586_p6 = scmp.eq.s32.totalorder %s1298_s19, 0 }
  0x47   : > { %1220 = dma.done.wait (%p1586_p6), [#allocation6], 16384   ;;  %p1587_p8 = pmov %p1586_p6 }
  0x48   : > { %v1411_v0 = vld [vmem:[%s202_s13 + $0x20] sm:$0xff]  ;;  %v1413_v1 = vld [vmem:[%s202_s13 + $0x28] sm:$0xff]  ;;  %v1421_v5 = vld [vmem:[%s202_s13 + $0x30] sm:$0xff]  ;;  %v1247_v16 = vmov 0.0   ;;  %vm1248_vm0 = vmmov 0   ;;  %v271_v21 = vlaneseq  ;;  %vm282_vm1 = vcmask 130112  }
  0x49   : > { %1222 = vsyncadd (%p1587_p8), [#allocation6], 4294950912  ;;  %v1415_v2 = vld [vmem:[%s202_s13] sm:$0xff]  ;;  %v245_v3 = vadd.f32 %v1413_v1, %v1411_v0  ;;  %v1419_v4 = vld [vmem:[%s202_s13 + $0x8] sm:$0xff]  ;;  %v261_v15 = vmax.f32 %v1411_v0, %v1413_v1  ;;  %1028 = vmatprep.subr.mxu0 %v1247_v16  ;;  %1039 = vmatprep.subr.mxu1 %v1247_v16  ;;  %vm289_vm2 = vcmask 195712   ;;  %vm296_vm3 = vcmask 261312  }
  0x4a   : > { %v1423_v6 = vld [vmem:[%s202_s13 + $0x38] sm:$0xff]  ;;  %v239_v7 = vadd.f32 %v1419_v4, %v1415_v2  ;;  %v1427_v8 = vld [vmem:[%s202_s13 + $0x10] sm:$0xff]  ;;  %v255_v13 = vmax.f32 %v1415_v2, %v1419_v4  ;;  %v326_v19 = vld [vmem:[%s1569_s1 + $0x8] sm:$0xff]  ;;  %1036 = vmatprep.mubr.msk.f32.mxu0 %vm1248_vm0, %v1247_v16  ;;  %1041 = vmatprep.mubr.msk.f32.mxu1 %vm1248_vm0, %v1247_v16  ;;  %v272_v22 = vand.u32 127, %v271_v21  ;;  %v1455_v25 = vshrl.u32 %v271_v21, 7  ;;  %s1008_s20 = sshll.u32 %s1399_s30, 7 }
  0x4b   : > { %v1429_v9 = vld [vmem:[%s202_s13 + $0x18] sm:$0xff]  ;;  %246 = vadd.xlane.f32.xlu1 %v245_v3  ;;  %v248_v10 = vadd.f32 %v1423_v6, %v1421_v5  ;;  %v264_v14 = vmax.f32 %v1421_v5, %v1423_v6  ;;  %v327_v18 = vld [vmem:[%s1569_s1 + $0x10] sm:$0xff]  ;;  %v325_v20 = vld [vmem:[%s1569_s1] sm:$0xff]  ;;  %vm323_vm4 = vcmask 1040384   ;;  %vm329_vm5 = vcmask 261120   ;;  %s1488_s25 = scalar_lea.vmem [#allocation7], %s1008_s20 }
  0x4c   : > { %240 = vadd.xlane.f32.xlu0 %v239_v7  ;;  %v242_v11 = vadd.f32 %v1429_v9, %v1427_v8  ;;  %v258_v12 = vmax.f32 %v1427_v8, %v1429_v9  ;;  %v328_v17 = vld [vmem:[%s1569_s1 + $0x18] sm:$0xff]  ;;  %v277_v24 = vadd.s32 4294967288, %v272_v22  ;;  %v284_v27 = vadd.s32 4294967280, %v272_v22  ;;  %v430_v58 = vld [vmem:[%s1570_s2] sm:$0x3]  ;;  %v665_v61 = vld [vmem:[#allocation5 + $0x2f0] sm:$0xff] }
  0x4d   : > { %1029 = vmatpush3.msra.mxu0 %v328_v17  ;;  %v275_v30 = vsub.s32 %v272_v22, %v1455_v25  ;;  %v291_v32 = vadd.s32 4294967272, %v272_v22  ;;  %vm435_vm6 = vcmask 1041408   ;;  %v602_v59 = vld [vmem:[#allocation5 + $0xf8] sm:$0xff]  ;;  %v664_v62 = vld [vmem:[#allocation5 + $0x2e8] sm:$0xff]  ;;  %v663_v63 = vld [vmem:[#allocation5 + $0x2e0] sm:$0xff]  ;;  %vm431_vm8 = vcmask 15360  }
  0x4e   : > { %1030 = vmatprep.subr.mxu0 %v1247_v16  ;;  %v280_v29 = vsub.s32 %v277_v24, %v1455_v25  ;;  %v287_v35 = vsub.s32 %v284_v27, %v1455_v25  ;;  %1040 = vmatpush3.msk.msra.mxu1 %vm435_vm6, %v430_v58  ;;  %v666_v60 = vld [vmem:[#allocation5 + $0x2f8] sm:$0xff]  ;;  %v661_v7 = vld [vmem:[#allocation5 + $0x2d0] sm:$0xff]  ;;  %v648_v22 = vld [vmem:[#allocation5 + $0x268] sm:$0xff]  ;;  %s1020_s7 = sshll.u32 %s1298_s19, 11  ;;  %s915_s8 = sshll.u32 %s1488_s25, 4  ;;  %s1521_s8 = int_to_ptr.vmem [resolvable:$true] %s915_s8 }
  0x4f   : > { %249 = vadd.xlane.f32.xlu1 %v248_v10  ;;  %1031 = vmatpush3.msra.mxu0 %v327_v18  ;;  %v294_v40 = vsub.s32 %v291_v32, %v1455_v25  ;;  %v662_v3 = vld [vmem:[#allocation5 + $0x2d8] sm:$0xff]  ;;  %v660_v10 = vld [vmem:[#allocation5 + $0x2c8] sm:$0xff]  ;;  %v653_v17 = vld [vmem:[#allocation5 + $0x290] sm:$0xff]  ;;  %s1519_s21 = scalar_lea.hbm %s1572_s4, %s1020_s7  ;;  %s902_s19 = scalar_lea.sflag [#allocation4], %s1399_s30 }
  0x50   : > { %243 = vadd.xlane.f32.xlu0 %v242_v11  ;;  %1032 = vmatprep.subr.mxu0 %v1247_v16  ;;  %v659_v11 = vld [vmem:[#allocation5 + $0x2c0] sm:$0xff]  ;;  %v652_v18 = vld [vmem:[#allocation5 + $0x288] sm:$0xff]  ;;  %v649_v21 = vld [vmem:[#allocation5 + $0x270] sm:$0xff]  ;;  %s1173_s23 = scalar_lea.vmem %s1521_s8, 2048  ;;  %p1588_p11 = scmp.ne.s32.totalorder %s1582_s10, 0 }
  0x51   : > { %1033 = vmatpush3.msra.mxu0 %v326_v19  ;;  %699 = vmatprep.subr.mxu1 %v602_v59  ;;  %v651_v19 = vld [vmem:[#allocation5 + $0x280] sm:$0xff]  ;;  %v646_v24 = vld [vmem:[#allocation5 + $0x258] sm:$0xff]  ;;  %v644_v27 = vld [vmem:[#allocation5 + $0x248] sm:$0xff]  ;;  %p1174_p3 = scmp.ne.s32.totalorder %s1521_s8, %s1173_s23  ;;  %s1249_s5 = smov [#allocation7]  }
  0x52   : > { %1034 = vmatprep.subr.mxu0 %v1247_v16  ;;  %v654_v16 = vld [vmem:[#allocation5 + $0x298] sm:$0xff]  ;;  %v639_v32 = vld [vmem:[#allocation5 + $0x220] sm:$0xff]  ;;  %v677_v58 = vld [vmem:[#allocation5 + $0x350] sm:$0xff]  ;;  %s1177_s6 = sshll.u32 %s1249_s5, 4  ;;  %s1178_s6 = int_to_ptr.vmem [resolvable:$false] %s1177_s6 }
  0x53   : > { %259 = vmax.xlane.f32.xlu1 %v258_v12  ;;  %1035 = vmatpush3.msra.mxu0 %v325_v20  ;;  %v658_v12 = vld [vmem:[#allocation5 + $0x2b8] sm:$0xff]  ;;  %v676_v59 = vld [vmem:[#allocation5 + $0x348] sm:$0xff]  ;;  %p1175_p7 = pnand %p1174_p3, %p1588_p11  ;;  %s1179_s24 = scalar_lea.vmem %s1178_s6, 4096 }
  0x54   : > { %256 = vmax.xlane.f32.xlu0 %v255_v13  ;;  %770 = vmatprep.subr.mxu0 %v666_v60  ;;  %v657_v13 = vld [vmem:[#allocation5 + $0x2b0] sm:$0xff]  ;;  %v650_v20 = vld [vmem:[#allocation5 + $0x278] sm:$0xff]  ;;  %v675_v60 = vld [vmem:[#allocation5 + $0x340] sm:$0xff]  ;;  %p1180_p10 = scmp.lt.s32.totalorder %s1521_s8, %s1178_s6  ;;  %p1181_p12 = scmp.lt.s32.totalorder %s1179_s24, %s1173_s23 }
  0x55   : > { %p1176_p9 = pneg %p1175_p7 }
  0x56   : > { %p1182_p13 = por %p1181_p12, %p1180_p10 }
  0x57   : > { %265 = vmax.xlane.f32.xlu1 %v264_v14  ;;  %v656_v14 = vld [vmem:[#allocation5 + $0x2a8] sm:$0xff] }
  0x58   : > { %262 = vmax.xlane.f32.xlu0 %v261_v15  ;;  %v655_v15 = vld [vmem:[#allocation5 + $0x2a0] sm:$0xff]  ;;  %p1183_p0 = pnand %p1182_p13, %p1176_p9 }
  0xd4   : > { %v247_v23 = vpop.xlane.xlu1 %246 }
  0xd5   : > { %v241_v26 = vpop.xlane.xlu0 %240  ;;  %v253_v36 = vmul.f32 0.00390625, %v247_v23  ;;  %v647_v23 = vld [vmem:[#allocation5 + $0x260] sm:$0xff] }
  0xd6   : > { %v251_v31 = vmul.f32 0.00390625, %v241_v26  ;;  %v645_v26 = vld [vmem:[#allocation5 + $0x250] sm:$0xff] }
  0xd7   : > { %v288_v46 = vrot.slane %v253_v36, %v287_v35  ;;  %v635_v36 = vld [vmem:[#allocation5 + $0x200] sm:$0xff] }
  0xd8   : > { %v250_v28 = vpop.xlane.xlu1 %249  ;;  %v276_v39 = vrot.slane %v251_v31, %v275_v30  ;;  %v640_v31 = vld [vmem:[#allocation5 + $0x228] sm:$0xff] }
  0xd9   : > { %v244_v33 = vpop.xlane.xlu0 %243  ;;  %v254_v41 = vmul.f32 0.00390625, %v250_v28  ;;  %v643_v28 = vld [vmem:[#allocation5 + $0x240] sm:$0xff] }
  0xda   : > { %v252_v34 = vmul.f32 0.00390625, %v244_v33  ;;  %v638_v33 = vld [vmem:[#allocation5 + $0x218] sm:$0xff] }
  0xdb   : > { %v295_v48 = vrot.slane %v254_v41, %v294_v40  ;;  %v694_v41 = vld [vmem:[#allocation5 + $0x3d8] sm:$0xff] }
  0xdc   : > { %v281_v37 = vrot.slane %v252_v34, %v280_v29  ;;  %v260_v38 = vpop.xlane.xlu1 %259  ;;  %v637_v34 = vld [vmem:[#allocation5 + $0x210] sm:$0xff] }
  0xdd   : > { %v257_v42 = vpop.xlane.xlu0 %256  ;;  %v310_v44 = vrot.slane %v260_v38, %v280_v29  ;;  %v642_v29 = vld [vmem:[#allocation5 + $0x238] sm:$0xff]  ;;  %v697_v38 = vld [vmem:[#allocation5 + $0x3f0] sm:$0xff] }
  0xde   : > { %v283_v43 = vsel %vm282_vm1, %v281_v37, %v276_v39  ;;  %v306_v45 = vrot.slane %v257_v42, %v275_v30  ;;  %v641_v30 = vld [vmem:[#allocation5 + $0x230] sm:$0xff]  ;;  %v698_v37 = vld [vmem:[#allocation5 + $0x3f8] sm:$0xff]  ;;  %v696_v39 = vld [vmem:[#allocation5 + $0x3e8] sm:$0xff] }
  0xdf   : > { %v290_v52 = vsel %vm289_vm2, %v288_v46, %v283_v43  ;;  %v693_v42 = vld [vmem:[#allocation5 + $0x3d0] sm:$0xff]  ;;  %v692_v43 = vld [vmem:[#allocation5 + $0x3c8] sm:$0xff] }
  0xe0   : > { %v266_v47 = vpop.xlane.xlu1 %265  ;;  %v311_v53 = vsel %vm282_vm1, %v310_v44, %v306_v45  ;;  %v297_v56 = vsel %vm296_vm3, %v295_v48, %v290_v52  ;;  %v691_v44 = vld [vmem:[#allocation5 + $0x3c0] sm:$0xff]  ;;  %v690_v45 = vld [vmem:[#allocation5 + $0x3b8] sm:$0xff]  ;;  %v689_v46 = vld [vmem:[#allocation5 + $0x3b0] sm:$0xff] }
  0xe1   : > { %v263_v49 = vpop.xlane.xlu0 %262  ;;  %v320_v50 = vrot.slane %v266_v47, %v294_v40  ;;  %v695_v40 = vld [vmem:[#allocation5 + $0x3e0] sm:$0xff]  ;;  %v688_v47 = vld [vmem:[#allocation5 + $0x3a8] sm:$0xff] }
  0xe2   : > { %v315_v51 = vrot.slane %v263_v49, %v287_v35  ;;  %v636_v35 = vld [vmem:[#allocation5 + $0x208] sm:$0xff]  ;;  %v687_v48 = vld [vmem:[#allocation5 + $0x3a0] sm:$0xff]  ;;  %v686_v49 = vld [vmem:[#allocation5 + $0x398] sm:$0xff] }
  0xe3   : > { %v683_v52 = vld [vmem:[#allocation5 + $0x380] sm:$0xff] }
  0xe4   : > { %v316_v54 = vsel %vm289_vm2, %v315_v51, %v311_v53  ;;  %v684_v51 = vld [vmem:[#allocation5 + $0x388] sm:$0xff]  ;;  %v682_v53 = vld [vmem:[#allocation5 + $0x378] sm:$0xff] }
  0xe5   : > { %v321_v55 = vsel %vm296_vm3, %v320_v50, %v316_v54  ;;  %v685_v50 = vld [vmem:[#allocation5 + $0x390] sm:$0xff] }
  0xe6   : > { %v324_v57 = vsel %vm323_vm4, %v297_v56, %v321_v55  ;;  %v681_v54 = vld [vmem:[#allocation5 + $0x370] sm:$0xff]  ;;  %v680_v55 = vld [vmem:[#allocation5 + $0x368] sm:$0xff]  ;;  %v679_v56 = vld [vmem:[#allocation5 + $0x360] sm:$0xff] }
  0xe7   : > { %1037 = vmatmul.mubr.msk.f32.vlgmr.msra.gmra.mxu0 %vm329_vm5, %v324_v57  ;;  %v678_v57 = vld [vmem:[#allocation5 + $0x358] sm:$0xff] }
  0xe8   : > { %771 = vmatpush1.msra.mxu0 %v665_v61  ;;  %v674_v61 = vld [vmem:[#allocation5 + $0x338] sm:$0xff] }
  0xe9   : > { %772 = vmatprep.subr.mxu0 %v664_v62  ;;  %v673_v62 = vld [vmem:[#allocation5 + $0x330] sm:$0xff] }
  0xea   : > { %773 = vmatpush1.msra.mxu0 %v663_v63  ;;  %v672_v63 = vld [vmem:[#allocation5 + $0x328] sm:$0xff] }
  0xeb   : > { %774 = vmatprep.subr.mxu0 %v662_v3  ;;  %v671_v3 = vld [vmem:[#allocation5 + $0x320] sm:$0xff] }
  0xec   : > { %775 = vmatpush1.msra.mxu0 %v661_v7  ;;  %v670_v7 = vld [vmem:[#allocation5 + $0x318] sm:$0xff] }
  0xed   : > { %776 = vmatprep.subr.mxu0 %v660_v10  ;;  %v669_v10 = vld [vmem:[#allocation5 + $0x310] sm:$0xff] }
  0xee   : > { %777 = vmatpush1.msra.mxu0 %v659_v11  ;;  %v668_v11 = vld [vmem:[#allocation5 + $0x308] sm:$0xff] }
  0xef   : > { %778 = vmatprep.subr.mxu0 %v658_v12  ;;  %v667_v12 = vld [vmem:[#allocation5 + $0x300] sm:$0xff] }
  0xf0   : > { %779 = vmatpush1.msra.mxu0 %v657_v13  ;;  %v562_v13 = vmax.f32 %v1419_v4, %v1413_v1 }
  0xf1   : > { %780 = vmatprep.subr.mxu0 %v656_v14  ;;  %v563_v14 = vmax.f32 %v1429_v9, %v1423_v6 }
  0xf2   : > { %781 = vmatpush1.msra.mxu0 %v655_v15  ;;  %v553_v15 = vmax.f32 %v1415_v2, %v1411_v0 }
  0xf3   : > { %782 = vmatprep.subr.mxu0 %v654_v16  ;;  %v554_v16 = vmax.f32 %v1427_v8, %v1421_v5 }
  0xf4   : > { %783 = vmatpush1.msra.mxu0 %v653_v17  ;;  %v564_v17 = vmax.f32 %v562_v13, %v563_v14  ;;  %v601_v13 = vld [vmem:[#allocation5 + $0xf0] sm:$0xff]  ;;  %v600_v14 = vld [vmem:[#allocation5 + $0xe8] sm:$0xff] }
  0xf5   : > { %784 = vmatprep.subr.mxu0 %v652_v18  ;;  %v555_v18 = vmax.f32 %v553_v15, %v554_v16  ;;  %v599_v15 = vld [vmem:[#allocation5 + $0xe0] sm:$0xff]  ;;  %v598_v16 = vld [vmem:[#allocation5 + $0xd8] sm:$0xff] }
  0xf6   : > { %785 = vmatpush1.msra.mxu0 %v651_v19  ;;  %v565_v19 = vrot.slane %v564_v17, 4 }
  0xf7   : > { %786 = vmatprep.subr.mxu0 %v650_v20  ;;  %v556_v20 = vrot.slane %v555_v18, 4 }
  0xf8   : > { %787 = vmatpush1.msra.mxu0 %v649_v21  ;;  %v566_v21 = vmax.f32 %v564_v17, %v565_v19  ;;  %v597_v17 = vld [vmem:[#allocation5 + $0xd0] sm:$0xff]  ;;  %v595_v19 = vld [vmem:[#allocation5 + $0xc0] sm:$0xff] }
  0xf9   : > { %788 = vmatprep.subr.mxu0 %v648_v22  ;;  %v557_v22 = vmax.f32 %v555_v18, %v556_v20  ;;  %v596_v18 = vld [vmem:[#allocation5 + $0xc8] sm:$0xff]  ;;  %v594_v20 = vld [vmem:[#allocation5 + $0xb8] sm:$0xff] }
  0xfa   : > { %789 = vmatpush1.msra.mxu0 %v647_v23  ;;  %v567_v23 = vrot.slane %v566_v21, 2 }
  0xfb   : > { %790 = vmatprep.subr.mxu0 %v646_v24  ;;  %v558_v24 = vrot.slane %v557_v22, 2 }
  0xfc   : > { %791 = vmatpush1.msra.mxu0 %v645_v26  ;;  %v568_v26 = vmax.f32 %v566_v21, %v567_v23  ;;  %v593_v21 = vld [vmem:[#allocation5 + $0xb0] sm:$0xff]  ;;  %v591_v23 = vld [vmem:[#allocation5 + $0xa0] sm:$0xff] }
  0xfd   : > { %792 = vmatprep.subr.mxu0 %v644_v27  ;;  %v559_v27 = vmax.f32 %v557_v22, %v558_v24  ;;  %v592_v22 = vld [vmem:[#allocation5 + $0xa8] sm:$0xff]  ;;  %v590_v24 = vld [vmem:[#allocation5 + $0x98] sm:$0xff] }
  0xfe   : > { %793 = vmatpush1.msra.mxu0 %v643_v28  ;;  %v569_v28 = vrot.slane %v568_v26, 1 }
  0xff   : > { %794 = vmatprep.subr.mxu0 %v642_v29 }
 0x100   : > { %795 = vmatpush1.msra.mxu0 %v641_v30  ;;  %v560_v30 = vrot.slane %v559_v27, 1 }
 0x101   : > { %796 = vmatprep.subr.mxu0 %v640_v31 }
 0x102   : > { %797 = vmatpush1.msra.mxu0 %v639_v32  ;;  %v570_v32 = vmax.f32 %v568_v26, %v569_v28  ;;  %v589_v26 = vld [vmem:[#allocation5 + $0x90] sm:$0xff]  ;;  %v587_v28 = vld [vmem:[#allocation5 + $0x80] sm:$0xff] }
 0x103   : > { %798 = vmatprep.subr.mxu0 %v638_v33 }
 0x104   : > { %799 = vmatpush1.msra.mxu0 %v637_v34  ;;  %v561_v34 = vmax.f32 %v559_v27, %v560_v30  ;;  %834 = vmatprep.mubr.f32.mxu0 %v570_v32  ;;  %v588_v27 = vld [vmem:[#allocation5 + $0x88] sm:$0xff]  ;;  %v585_v30 = vld [vmem:[#allocation5 + $0x70] sm:$0xff]  ;;  %v583_v32 = vld [vmem:[#allocation5 + $0x60] sm:$0xff] }
 0x105   : > { %800 = vmatprep.subr.mxu0 %v636_v35 }
 0x106   : > { %801 = vmatpush1.msra.mxu0 %v635_v36 }
 0x107   : > { %802 = vmatprep.subr.mxu0 %v698_v37 }
 0x108   : > { %803 = vmatpush2.msra.mxu0 %v697_v38  ;;  %v542_v38 = vadd.f32 %v1429_v9, %v1419_v4 }
 0x109   : > { %804 = vmatprep.subr.mxu0 %v696_v39 }
 0x10a   : > { %805 = vmatpush2.msra.mxu0 %v695_v40  ;;  %v543_v40 = vadd.f32 %v542_v38, %v1413_v1  ;;  %v577_v38 = vld [vmem:[#allocation5 + $0x30] sm:$0xff] }
 0x10b   : > { %806 = vmatprep.subr.mxu0 %v694_v41 }
 0x10c   : > { %807 = vmatpush2.msra.mxu0 %v693_v42  ;;  %v544_v42 = vadd.f32 %v543_v40, %v1423_v6  ;;  %v575_v40 = vld [vmem:[#allocation5 + $0x20] sm:$0xff] }
 0x10d   : > { %808 = vmatprep.subr.mxu0 %v692_v43 }
 0x10e   : > { %809 = vmatpush2.msra.mxu0 %v691_v44 }
 0x10f   : > { %810 = vmatprep.subr.mxu0 %v690_v45 }
 0x110   : > { %811 = vmatpush2.msra.mxu0 %v689_v46 }
 0x111   : > { %812 = vmatprep.subr.mxu0 %v688_v47  ;;  %v545_v47 = vrot.slane %v544_v42, 4 }
 0x112   : > { %813 = vmatpush2.msra.mxu0 %v687_v48 }
 0x113   : > { %814 = vmatprep.subr.mxu0 %v686_v49 }
 0x114   : > { %815 = vmatpush2.msra.mxu0 %v685_v50  ;;  %v546_v50 = vadd.f32 %v545_v47, %v544_v42  ;;  %v574_v42 = vld [vmem:[#allocation5 + $0x18] sm:$0xff] }
 0x115   : > { %816 = vmatprep.subr.mxu0 %v684_v51  ;;  %v634_v47 = vld [vmem:[#allocation5 + $0x1f8] sm:$0xff] }
 0x116   : > { %817 = vmatpush2.msra.mxu0 %v683_v52 }
 0x117   : > { %818 = vmatprep.subr.mxu0 %v682_v53  ;;  %v547_v53 = vrot.slane %v546_v50, 2 }
 0x118   : > { %819 = vmatpush2.msra.mxu0 %v681_v54 }
 0x119   : > { %820 = vmatprep.subr.mxu0 %v680_v55 }
 0x11a   : > { %821 = vmatpush2.msra.mxu0 %v679_v56  ;;  %v548_v56 = vadd.f32 %v547_v53, %v546_v50  ;;  %v631_v50 = vld [vmem:[#allocation5 + $0x1e0] sm:$0xff]  ;;  %v629_v53 = vld [vmem:[#allocation5 + $0x1d0] sm:$0xff] }
 0x11b   : > { %822 = vmatprep.subr.mxu0 %v678_v57 }
 0x11c   : > { %823 = vmatpush2.msra.mxu0 %v677_v58 }
 0x11d   : > { %824 = vmatprep.subr.mxu0 %v676_v59 }
 0x11e   : > { %825 = vmatpush2.msra.mxu0 %v675_v60  ;;  %v549_v60 = vrot.slane %v548_v56, 1 }
 0x11f   : > { %826 = vmatprep.subr.mxu0 %v674_v61 }
 0x120   : > { %827 = vmatpush2.msra.mxu0 %v673_v62 }
 0x121   : > { %828 = vmatprep.subr.mxu0 %v672_v63  ;;  %v550_v63 = vadd.f32 %v549_v60, %v548_v56  ;;  %v623_v60 = vld [vmem:[#allocation5 + $0x1a0] sm:$0xff] }
 0x122   : > { %829 = vmatpush2.msra.mxu0 %v671_v3 }
 0x123   : > { %830 = vmatprep.subr.mxu0 %v670_v7 }
 0x124   : > { %831 = vmatpush2.msra.mxu0 %v669_v10 }
 0x125   : > { %832 = vmatprep.subr.mxu0 %v668_v11  ;;  %v552_v11 = vmul.f32 0.03125, %v550_v63  ;;  %v621_v63 = vld [vmem:[#allocation5 + $0x190] sm:$0xff] }
 0x126   : > { %833 = vmatpush2.msra.mxu0 %v667_v12 }
 0x127   : > { %835 = vmatmul.mubr.f32.vlgmr.msra.gmra.mxu0 %v561_v34  ;;  %v581_v34 = vld [vmem:[#allocation5 + $0x50] sm:$0xff] }
 0x1a7   : > { %v399_v29 = vpop.f32.mrf.mxu0 }
 0x1a8   : > { %v404_v31 = vmul.f32 0.70710677, %v399_v29  ;;  %v403_v7 = vmul.f32 0.5, %v399_v29  ;;  %v586_v29 = vld [vmem:[#allocation5 + $0x78] sm:$0xff] }
 0x1a9   : > { %v1038_v33 = vpop.f32.mrf.mxu0 }
 0x1aa   : > { %v405_v35 = vand.u32 2147483647, %v404_v31  ;;  %vm425_vm7 = vcmp.ge.f32.partialorder %v404_v31, 0.0  ;;  %v584_v31 = vld [vmem:[#allocation5 + $0x68] sm:$0xff]  ;;  %v582_v33 = vld [vmem:[#allocation5 + $0x58] sm:$0xff] }
 0x1ac   : > { %v406_v36 = vmul.f32 0.3275911, %v405_v35  ;;  %v419_v39 = vsub.f32 0.0, %v405_v35 }
 0x1ae   : > { %v407_v37 = vadd.f32 1.0, %v406_v36  ;;  %v420_v41 = vmul.f32 %v419_v39, %v405_v35  ;;  %v580_v35 = vld [vmem:[#allocation5 + $0x48] sm:$0xff]  ;;  %v579_v36 = vld [vmem:[#allocation5 + $0x40] sm:$0xff] }
 0x1af   : > { %v576_v39 = vld [vmem:[#allocation5 + $0x28] sm:$0xff] }
 0x1b0   : > { %1107 = vrcp.f32 %v407_v37  ;;  %v421_v45 = vmul.f32 1.442695, %v420_v41  ;;  %v578_v37 = vld [vmem:[#allocation5 + $0x38] sm:$0xff]  ;;  %v533_v41 = vadd.f32 %v1427_v8, %v1415_v2 }
 0x1b2   : > { %1109 = vpow2.f32 %v421_v45  ;;  %v571_v45 = vld [vmem:[#allocation5] sm:$0xff] }
 0x1bd   : > { %v1108_v43 = vpop.eup %1107 }
 0x1be   : > { %v410_v44 = vmul.f32 1.0614054, %v1108_v43 }
 0x1bf   : > { %v1110_v58 = vpop.eup %1109 }
 0x1c0   : > { %v411_v46 = vadd.f32 -1.4531521, %v410_v44  ;;  %v572_v44 = vld [vmem:[#allocation5 + $0x8] sm:$0xff] }
 0x1c2   : > { %v412_v48 = vmul.f32 %v1108_v43, %v411_v46  ;;  %v534_v46 = vadd.f32 %v533_v41, %v1411_v0 }
 0x1c4   : > { %v413_v49 = vadd.f32 1.4214138, %v412_v48  ;;  %v633_v48 = vld [vmem:[#allocation5 + $0x1f0] sm:$0xff] }
 0x1c6   : > { %v414_v51 = vmul.f32 %v1108_v43, %v413_v49  ;;  %v632_v49 = vld [vmem:[#allocation5 + $0x1e8] sm:$0xff] }
 0x1c8   : > { %v415_v52 = vadd.f32 -0.28449672, %v414_v51  ;;  %v535_v51 = vadd.f32 %v534_v46, %v1421_v5 }
 0x1ca   : > { %v416_v54 = vmul.f32 %v1108_v43, %v415_v52  ;;  %v630_v52 = vld [vmem:[#allocation5 + $0x1d8] sm:$0xff]  ;;  %v536_v56 = vrot.slane %v535_v51, 4 }
 0x1cc   : > { %v417_v55 = vadd.f32 0.2548296, %v416_v54  ;;  %v628_v54 = vld [vmem:[#allocation5 + $0x1c8] sm:$0xff] }
 0x1ce   : > { %v418_v57 = vmul.f32 %v1108_v43, %v417_v55  ;;  %v573_v43 = vld [vmem:[#allocation5 + $0x10] sm:$0xff]  ;;  %v627_v55 = vld [vmem:[#allocation5 + $0x1c0] sm:$0xff] }
 0x1d0   : > { %v423_v59 = vmul.f32 %v1110_v58, %v418_v57  ;;  %v626_v57 = vld [vmem:[#allocation5 + $0x1b8] sm:$0xff]  ;;  %v625_v58 = vld [vmem:[#allocation5 + $0x1b0] sm:$0xff] }
 0x1d2   : > { %v424_v61 = vsub.f32 1.0, %v423_v59  ;;  %v624_v59 = vld [vmem:[#allocation5 + $0x1a8] sm:$0xff] }
 0x1d4   : > { %v426_v62 = vsub.f32 0.0, %v424_v61 }
 0x1d6   : > { %v427_v3 = vsel %vm425_vm7, %v424_v61, %v426_v62  ;;  %v537_v61 = vadd.f32 %v536_v56, %v535_v51  ;;  %v622_v62 = vld [vmem:[#allocation5 + $0x198] sm:$0xff] }
 0x1d7   : > { %v428_v10 = vadd.f32 1.0, %v427_v3  ;;  %v620_v3 = vld [vmem:[#allocation5 + $0x188] sm:$0xff] }
 0x1d9   : > { %v429_v12 = vmul.f32 %v428_v10, %v403_v7  ;;  %v619_v7 = vld [vmem:[#allocation5 + $0x180] sm:$0xff]  ;;  %v538_v10 = vrot.slane %v537_v61, 2 }
 0x1db   : > { %1042 = vmatmul.mubr.msk.f32.vlgmr.msra.gmra.mxu1 %vm431_vm8, %v429_v12  ;;  %v617_v12 = vld [vmem:[#allocation5 + $0x170] sm:$0xff] }
 0x1dc   : > { %700 = vmatpush1.msra.mxu1 %v601_v13  ;;  %763 = vmatprep.mubr.f32.mxu1 %v552_v11  ;;  %v618_v11 = vld [vmem:[#allocation5 + $0x178] sm:$0xff]  ;;  %v616_v13 = vld [vmem:[#allocation5 + $0x168] sm:$0xff] }
 0x1dd   : > { %701 = vmatprep.subr.mxu1 %v600_v14  ;;  %v615_v14 = vld [vmem:[#allocation5 + $0x160] sm:$0xff] }
 0x1de   : > { %702 = vmatpush1.msra.mxu1 %v599_v15  ;;  %v539_v15 = vadd.f32 %v538_v10, %v537_v61 }
 0x1df   : > { %703 = vmatprep.subr.mxu1 %v598_v16  ;;  %v614_v16 = vld [vmem:[#allocation5 + $0x158] sm:$0xff] }
 0x1e0   : > { %704 = vmatpush1.msra.mxu1 %v597_v17  ;;  %v613_v17 = vld [vmem:[#allocation5 + $0x150] sm:$0xff] }
 0x1e1   : > { %705 = vmatprep.subr.mxu1 %v596_v18  ;;  %v612_v18 = vld [vmem:[#allocation5 + $0x148] sm:$0xff] }
 0x1e2   : > { %706 = vmatpush1.msra.mxu1 %v595_v19  ;;  %v611_v19 = vld [vmem:[#allocation5 + $0x140] sm:$0xff] }
 0x1e3   : > { %707 = vmatprep.subr.mxu1 %v594_v20  ;;  %v540_v20 = vrot.slane %v539_v15, 1 }
 0x1e4   : > { %708 = vmatpush1.msra.mxu1 %v593_v21  ;;  %v610_v21 = vld [vmem:[#allocation5 + $0x138] sm:$0xff] }
 0x1e5   : > { %709 = vmatprep.subr.mxu1 %v592_v22  ;;  %v609_v22 = vld [vmem:[#allocation5 + $0x130] sm:$0xff] }
 0x1e6   : > { %710 = vmatpush1.msra.mxu1 %v591_v23  ;;  %v608_v23 = vld [vmem:[#allocation5 + $0x128] sm:$0xff] }
 0x1e7   : > { %711 = vmatprep.subr.mxu1 %v590_v24  ;;  %v607_v24 = vld [vmem:[#allocation5 + $0x120] sm:$0xff] }
 0x1e8   : > { %712 = vmatpush1.msra.mxu1 %v589_v26  ;;  %v541_v26 = vadd.f32 %v540_v20, %v539_v15 }
 0x1e9   : > { %713 = vmatprep.subr.mxu1 %v588_v27  ;;  %v606_v27 = vld [vmem:[#allocation5 + $0x118] sm:$0xff] }
 0x1ea   : > { %714 = vmatpush1.msra.mxu1 %v587_v28  ;;  %v605_v28 = vld [vmem:[#allocation5 + $0x110] sm:$0xff] }
 0x1eb   : > { %715 = vmatprep.subr.mxu1 %v586_v29  ;;  %v604_v29 = vld [vmem:[#allocation5 + $0x108] sm:$0xff] }
 0x1ec   : > { %716 = vmatpush1.msra.mxu1 %v585_v30  ;;  %v603_v30 = vld [vmem:[#allocation5 + $0x100] sm:$0xff] }
 0x1ed   : > { %717 = vmatprep.subr.mxu1 %v584_v31  ;;  %v551_v31 = vmul.f32 0.03125, %v541_v26 }
 0x1ee   : > { %718 = vmatpush1.msra.mxu1 %v583_v32 }
 0x1ef   : > { %719 = vmatprep.subr.mxu1 %v582_v33 }
 0x1f0   : > { %720 = vmatpush1.msra.mxu1 %v581_v34 }
 0x1f1   : > { %721 = vmatprep.subr.mxu1 %v580_v35 }
 0x1f2   : > { %722 = vmatpush1.msra.mxu1 %v579_v36  ;;  %v516_v36 = vsub.s32 0, %v1455_v25 }
 0x1f3   : > { %723 = vmatprep.subr.mxu1 %v578_v37 }
 0x1f4   : > { %724 = vmatpush1.msra.mxu1 %v577_v38 }
 0x1f5   : > { %725 = vmatprep.subr.mxu1 %v576_v39  ;;  %v836_v39 = vpop.f32.mrf.mxu0 }
 0x1f6   : > { %726 = vmatpush1.msra.mxu1 %v575_v40 }
 0x1f7   : > { %727 = vmatprep.subr.mxu1 %v574_v42  ;;  %v838_v41 = vpop.f32.mrf.mxu0 }
 0x1f8   : > { %728 = vmatpush1.msra.mxu1 %v573_v43 }
 0x1f9   : > { %729 = vmatprep.subr.mxu1 %v572_v44 }
 0x1fa   : > { %730 = vmatpush1.msra.mxu1 %v571_v45 }
 0x1fb   : > { %731 = vmatprep.subr.mxu1 %v634_v47 }
 0x1fc   : > { %732 = vmatpush2.msra.mxu1 %v633_v48 }
 0x1fd   : > { %733 = vmatprep.subr.mxu1 %v632_v49 }
 0x1fe   : > { %734 = vmatpush2.msra.mxu1 %v631_v50 }
 0x1ff   : > { %735 = vmatprep.subr.mxu1 %v630_v52 }
 0x200   : > { %736 = vmatpush2.msra.mxu1 %v629_v53 }
 0x201   : > { %737 = vmatprep.subr.mxu1 %v628_v54 }
 0x202   : > { %738 = vmatpush2.msra.mxu1 %v627_v55 }
 0x203   : > { %739 = vmatprep.subr.mxu1 %v626_v57 }
 0x204   : > { %740 = vmatpush2.msra.mxu1 %v625_v58 }
 0x205   : > { %741 = vmatprep.subr.mxu1 %v624_v59 }
 0x206   : > { %742 = vmatpush2.msra.mxu1 %v623_v60 }
 0x207   : > { %743 = vmatprep.subr.mxu1 %v622_v62 }
 0x208   : > { %744 = vmatpush2.msra.mxu1 %v621_v63 }
 0x209   : > { %745 = vmatprep.subr.mxu1 %v620_v3 }
 0x20a   : > { %746 = vmatpush2.msra.mxu1 %v619_v7 }
 0x20b   : > { %747 = vmatprep.subr.mxu1 %v618_v11 }
 0x20c   : > { %748 = vmatpush2.msra.mxu1 %v617_v12 }
 0x20d   : > { %749 = vmatprep.subr.mxu1 %v616_v13 }
 0x20e   : > { %750 = vmatpush2.msra.mxu1 %v615_v14 }
 0x20f   : > { %751 = vmatprep.subr.mxu1 %v614_v16 }
 0x210   : > { %752 = vmatpush2.msra.mxu1 %v613_v17 }
 0x211   : > { %753 = vmatprep.subr.mxu1 %v612_v18 }
 0x212   : > { %754 = vmatpush2.msra.mxu1 %v611_v19 }
 0x213   : > { %755 = vmatprep.subr.mxu1 %v610_v21 }
 0x214   : > { %756 = vmatpush2.msra.mxu1 %v609_v22 }
 0x215   : > { %757 = vmatprep.subr.mxu1 %v608_v23 }
 0x216   : > { %758 = vmatpush2.msra.mxu1 %v607_v24 }
 0x217   : > { %759 = vmatprep.subr.mxu1 %v606_v27 }
 0x218   : > { %760 = vmatpush2.msra.mxu1 %v605_v28 }
 0x219   : > { %761 = vmatprep.subr.mxu1 %v604_v29 }
 0x21a   : > { %762 = vmatpush2.msra.mxu1 %v603_v30 }
 0x21b   : > { %764 = vmatmul.mubr.f32.vlgmr.msra.gmra.mxu1 %v551_v31 }
 0x29b   : > { %v505_v32 = vpop.f32.mrf.mxu1 }
 0x29c   : > { %v510_v33 = vrot.slane %v505_v32, 1 }
 0x29d   : > { %v1043_v34 = vpop.f32.mrf.mxu1 }
 0x29e   : > { %v512_v35 = vadd.f32 %v510_v33, %v505_v32 }
 0x2a0   : > { %v513_v37 = vmax.f32 %v512_v35, 0.0 }
 0x2a2   : > { %v517_v38 = vrot.slane %v513_v37, %v516_v36 }
 0x2a4   : > { %523 = vbcast.lane.b32.xlu1 %v517_v38, 264  ;;  %519 = vbcast.lane.b32.xlu0 %v517_v38, 256 }
 0x2a8   : > { %527 = vbcast.lane.b32.xlu1 %v517_v38, 272 }
 0x2ac   : > { %531 = vbcast.lane.b32.xlu1 %v517_v38, 280 }
 0x2db   : > { %v765_v40 = vpop.f32.mrf.mxu1 }
 0x2dc   : > { %v837_v42 = vadd.f32 %v836_v39, %v765_v40 }
 0x2dd   : > { %v767_v43 = vpop.f32.mrf.mxu1 }
 0x2de   : > { %v841_v44 = vmax.f32 %v837_v42, 0.0  ;;  %v839_v45 = vadd.f32 %v838_v41, %v767_v43 }
 0x2e0   : > { %v1012_v46 = vmul.f32 -1.442695, %v841_v44  ;;  %v842_v47 = vmax.f32 %v839_v45, 0.0 }
 0x2e2   : > { %1111 = vpow2.f32 %v1012_v46  ;;  %v1013_v48 = vmul.f32 -1.442695, %v842_v47 }
 0x2e4   : > { %1113 = vpow2.f32 %v1013_v48 }
 0x2ef   : > { %v1112_v25 = vpop.eup %1111 }
 0x2f0   : > { %v849_v49 = vadd.f32 1.0, %v1112_v25 }
 0x2f1   : > { %v1114_v50 = vpop.eup %1113 }
 0x2f2   : > { %1115 = vrcp.f32 %v849_v49  ;;  %v850_v51 = vadd.f32 1.0, %v1114_v50 }
 0x2f4   : > { %1117 = vrcp.f32 %v850_v51 }
 0x2ff   : > { %v1116_v52 = vpop.eup %1115 }
 0x300   : > { %v875_v53 = vadd.f32 1.0, %v1116_v52 }
 0x301   : > { %v1118_v54 = vpop.eup %1117 }
 0x302   : > { %v880_v55 = vrot.slane %v875_v53, %v516_v36  ;;  %v876_v56 = vadd.f32 1.0, %v1118_v54 }
 0x304   : > { %v885_v57 = vmul.f32 %v880_v55, %v1415_v2  ;;  %v887_v58 = vmul.f32 %v880_v55, %v1427_v8  ;;  %v889_v59 = vmul.f32 %v880_v55, %v1411_v0  ;;  %v891_v60 = vmul.f32 %v880_v55, %v1421_v5 }
 0x305   : > { %v884_v61 = vrot.slane %v876_v56, %v516_v36 }
 0x306   : > { %893 = vst [vmem:[%s1488_s25 + $0x40] sm:$0xff] %v885_v57  ;;  %895 = vst [vmem:[%s1488_s25 + $0x50] sm:$0xff] %v887_v58 }
 0x307   : > { %897 = vst [vmem:[%s1488_s25 + $0x60] sm:$0xff] %v889_v59  ;;  %899 = vst [vmem:[%s1488_s25 + $0x70] sm:$0xff] %v891_v60  ;;  %v886_v62 = vmul.f32 %v884_v61, %v1419_v4  ;;  %v888_v63 = vmul.f32 %v884_v61, %v1429_v9  ;;  %v890_v3 = vmul.f32 %v884_v61, %v1413_v1 }
 0x308   : > { %v892_v7 = vmul.f32 %v884_v61, %v1423_v6 }
 0x309   : > { %894 = vst [vmem:[%s1488_s25 + $0x48] sm:$0xff] %v886_v62  ;;  %896 = vst [vmem:[%s1488_s25 + $0x58] sm:$0xff] %v888_v63 }
 0x30a   : > { %898 = vst [vmem:[%s1488_s25 + $0x68] sm:$0xff] %v890_v3  ;;  %900 = vst [vmem:[%s1488_s25 + $0x78] sm:$0xff] %v892_v7 }
 0x316   : > { %v524_v10 = vpop.permute.xlu1 %523  ;;  %v520_v11 = vpop.permute.xlu0 %519 }
 0x317   : > { %v856_v12 = vadd.f32 1.0, %v524_v10  ;;  %v855_v13 = vadd.f32 1.0, %v520_v11 }
 0x319   : > { %v861_v14 = vmul.f32 %v856_v12, %v1427_v8  ;;  %v862_v15 = vmul.f32 %v856_v12, %v1429_v9  ;;  %v859_v16 = vmul.f32 %v855_v13, %v1415_v2  ;;  %v860_v17 = vmul.f32 %v855_v13, %v1419_v4 }
 0x31a   : > { %v528_v18 = vpop.permute.xlu1 %527 }
 0x31b   : > { %869 = vst [vmem:[%s1488_s25 + $0x10] sm:$0xff] %v861_v14  ;;  %870 = vst [vmem:[%s1488_s25 + $0x18] sm:$0xff] %v862_v15  ;;  %v857_v19 = vadd.f32 1.0, %v528_v18 }
 0x31c   : > { %867 = vst [vmem:[%s1488_s25] sm:$0xff] %v859_v16  ;;  %868 = vst [vmem:[%s1488_s25 + $0x8] sm:$0xff] %v860_v17 }
 0x31d   : > { %v863_v20 = vmul.f32 %v857_v19, %v1411_v0  ;;  %v864_v8 = vmul.f32 %v857_v19, %v1413_v1 }
 0x31e   : > { %v532_v9 = vpop.permute.xlu1 %531 }
 0x31f   : > { %871 = vst [vmem:[%s1488_s25 + $0x20] sm:$0xff] %v863_v20  ;;  %872 = vst [vmem:[%s1488_s25 + $0x28] sm:$0xff] %v864_v8  ;;  %v858_v2 = vadd.f32 1.0, %v532_v9 }
 0x321   : > { %v865_v0 = vmul.f32 %v858_v2, %v1421_v5  ;;  %v866_v1 = vmul.f32 %v858_v2, %v1423_v6 }
 0x323   : > { %873 = vst [vmem:[%s1488_s25 + $0x30] sm:$0xff] %v865_v0  ;;  %874 = vst [vmem:[%s1488_s25 + $0x38] sm:$0xff] %v866_v1 }
 0x324   : > { %1186 = shalt.err (!%p1183_p0)
}
 0x325   : > { %s1187_s26 = scalar_lea.hbm %s1519_s21, 2048  ;;  %s1191_s14 = scalar_lea.hbm %s1572_s4, 4096 }
 0x326   : > { %p1188_p5 = scmp.ne.s32.totalorder %s1519_s21, %s1187_s26  ;;  %p1192_p4 = scmp.lt.s32.totalorder %s1519_s21, %s1572_s4 }
 0x327   : > { %p1193_p6 = scmp.lt.s32.totalorder %s1191_s14, %s1187_s26 }
 0x328   : > { %p1189_p2 = pnand %p1188_p5, %p1588_p11 }
 0x329   : > { %p1194_p8 = por %p1193_p6, %p1192_p4 }
 0x32a   : > { %p1190_p1 = pneg %p1189_p2 }
 0x32c   : > { %p1195_p3 = pnand %p1194_p8, %p1190_p1 }
 0x32e   : > { %1198 = shalt.err (!%p1195_p3)
}
 0x32f   : > { %s1250_s25 = smov 256   ;;  %s1251_s7 = smov 16  }
 0x330   : > { %1050 = dma.vmem_to_hbm [thread:$0]  (%p1588_p11), %s1521_s8, 2048, %s1519_s21, %s902_s19, %s1250_s25, %s1250_s25, %s1251_s7  }
 0x331 PF: > { %s930_s12 = sand.u32 1, %s1229_s15   ;;  %p1589_p7 = scmp.ne.s32.totalorder %s1578_s22, 0 }
 0x332   : > { %p1590_p9 = scmp.ge.s32.totalorder %s1241_s18, 2  ;;  %s931_s13 = scalar_lea.sflag [#allocation4], %s930_s12 }
 0x334   : > { %p1061_p10 = pnand %p1590_p9, %p1589_p7 }
 0x336   : > { %p1062_p12 = pneg %p1061_p10 }
 0x338   : > { %1224 = dma.done.wait (%p1062_p12), %s931_s13, 2048  }
 0x339   : > { %1226 = vsyncadd (%p1062_p12), %s931_s13, 4294965248  ;;  %p18_p13 = scmp.ge.s32.totalorder %s1331_s27, 4   ;;  %s1591_s15 = smov %s1233_s16 }
 0x33a   : > { %s1592_s16 = smov %s1237_s17  ;;  %s1593_s17 = smov %s1351_s9 }
 0x33b   : > { %s1594_s18 = smov %s1331_s27  ;;  %20 = sbr.rel (!%p18_p13) target bundleno = 6 (0x6), region = 85 }
 0x340   :  { %936 = vsyncpa [#allocation3], 1 }
 0x341   :  { %938 = vsyncpa [#allocation3 + $0x1], 1 }
 0x342   :  { %939 = vsyncpa [#allocation6], 1 }
 0x343   :  { %940 = vsyncpa [#allocation4], 1 }
 0x344   :  { %942 = vsyncpa [#allocation4 + $0x1], 1 }

</bundles_post_ra>
